<compile_context>
chip_gen: v7x
topology: tpu7x:2x2x1
jax: 0.10.0
libtpu: 0.0.40
codegen_flags: <defaults>
</compile_context>

<pallas_src>
import functools

import jax
import jax.numpy as jnp
from jax.experimental import pallas as pl
from jax.experimental.pallas import tpu as pltpu


# ------------------------------------------------------------------ #
# Pallas kernel: fused   out = (x @ W + b) * scale + shift
# ------------------------------------------------------------------ #
def _linear_fused_kernel(x_ref, w_ref, b_ref, scale_ref, shift_ref, o_ref):
    acc = jnp.dot(x_ref[...], w_ref[...], preferred_element_type=jnp.float32)
    acc = acc + b_ref[...].astype(jnp.float32)
    o_ref[...] = (acc * scale_ref[...] + shift_ref[...]).astype(o_ref.dtype)


def _pick_tile(dim, pref):
    # Full extent when small / unaligned (block == full array dim waives the
    # (8,128) rule); otherwise an MXU-friendly tile width.
    if dim >= pref and dim % pref == 0:
        return pref
    return dim


@functools.partial(jax.jit, static_argnames=("tm", "tn"))
def _linear_fused_call(x, w, b2d, scale, shift, *, tm, tn):
    M, K = x.shape
    _, N = w.shape
    grid = (M // tm, N // tn)

    cost = pl.CostEstimate(
        flops=2 * M * K * N,
        transcendentals=0,
        bytes_accessed=4 * (M * K + K * N + N + 3 * M * N),
    )

    return pl.pallas_call(
        _linear_fused_kernel,
        out_shape=jax.ShapeDtypeStruct((M, N), x.dtype),
        grid_spec=pltpu.PrefetchScalarGridSpec(
            num_scalar_prefetch=0,
            grid=grid,
            in_specs=[
                pl.BlockSpec((tm, K), lambda i, j: (i, 0)),   # lhs: full K
                pl.BlockSpec((K, tn), lambda i, j: (0, j)),   # rhs: full K
                pl.BlockSpec((1, tn), lambda i, j: (0, j)),   # bias row
                pl.BlockSpec((tm, tn), lambda i, j: (i, j)),  # de-norm scale
                pl.BlockSpec((tm, tn), lambda i, j: (i, j)),  # de-norm shift
            ],
            out_specs=pl.BlockSpec((tm, tn), lambda i, j: (i, j)),
        ),
        compiler_params=pltpu.CompilerParams(
            dimension_semantics=("parallel", "parallel")
        ),
        cost_estimate=cost,
    )(x, w, b2d, scale, shift)


def pallas_linear_fused(x, w, b, scale, shift, *, tm=None, tn=None):
    """out[M, N] = (x[M, K] @ w[K, N] + b[N]) * scale[M, N] + shift[M, N]."""
    M, K = x.shape
    K2, N = w.shape
    assert K == K2 and b.shape == (N,)
    assert scale.shape == (M, N) and shift.shape == (M, N)
    if tm is None:
        tm = _pick_tile(M, 128)   # 128 rows feeds the MXU when M is large
    if tn is None:
        tn = _pick_tile(N, 256)   # 256 lanes on v6e/v7x; full-N when small
    return _linear_fused_call(x, w, b.reshape(1, N), scale, shift, tm=tm, tn=tn)


# ------------------------------------------------------------------ #
# Model: parameter init + forward (forecast)
# ------------------------------------------------------------------ #
def make_config():
    cfg = dict(
        task_name="forecast",
        seq_len=8,
        pred_len=4,
        time_cov_size=2,
        time_num=3,
        time_cat=2,
        time_num_class=[5, 7],
        time_cat_embed=[4, 3],
        tgt_num=2,
        meta_num=3,
        meta_cat=2,
        meta_num_class=[6, 4],
        meta_cat_embed=[2, 3],
        use_norm=True,
        output_attention=False,
    )
    cfg["window_size"] = cfg["seq_len"] + cfg["pred_len"]
    cfg["input_embed_size"] = (
        (cfg["time_num"] + sum(cfg["time_cat_embed"]) + cfg["time_cov_size"])
        * cfg["window_size"]
        + cfg["seq_len"] * cfg["tgt_num"]
        + cfg["meta_num"]
        + sum(cfg["meta_cat_embed"])
    )
    cfg["output_size"] = cfg["pred_len"] * cfg["tgt_num"]
    return cfg


def init_params(cfg, key):
    keys = jax.random.split(key, 2 + cfg["time_cat"] + cfg["meta_cat"])
    d_in, d_out = cfg["input_embed_size"], cfg["output_size"]
    params = {
        # projection weight stored as (D_in, D_out) so the kernel computes x @ W + b
        "W": jax.random.normal(keys[0], (d_in, d_out), jnp.float32)
        * (1.0 / jnp.sqrt(d_in)),
        "bias": jax.random.normal(keys[1], (d_out,), jnp.float32) * 0.01,
        "time_embed": [
            jax.random.normal(
                keys[2 + i],
                (cfg["time_num_class"][i], cfg["time_cat_embed"][i]),
                jnp.float32,
            )
            for i in range(cfg["time_cat"])
        ],
        "meta_embed": [
            jax.random.normal(
                keys[2 + cfg["time_cat"] + i],
                (cfg["meta_num_class"][i], cfg["meta_cat_embed"][i]),
                jnp.float32,
            )
            for i in range(cfg["meta_cat"])
        ],
    }
    return params


def build_enc_in(params, cfg, given_enc, x_enc, x_mark_enc, meta_x):
    """Normalization + embedding lookups + flatten/concat (plain-JAX glue)."""
    # TODO(synk): embedding gathers / RevIN stats stay in plain JAX (tiny,
    # data-dependent gathers; no clean / beneficial Pallas equivalent here).
    b = given_enc.shape[0]

    if cfg["use_norm"]:
        means = jnp.mean(x_enc, axis=1, keepdims=True)
        x_c = x_enc - means
        stdev = jnp.sqrt(jnp.var(x_c, axis=1, keepdims=True) + 1e-5)
        x_n = x_c / stdev
    else:
        means = jnp.zeros((b, 1, cfg["tgt_num"]), x_enc.dtype)
        stdev = jnp.ones((b, 1, cfg["tgt_num"]), x_enc.dtype)
        x_n = x_enc

    tc = cfg["time_cat"]
    given_num = given_enc[:, :, : given_enc.shape[-1] - tc]
    given_cat = [
        params["time_embed"][i][given_enc[:, :, -tc + i].astype(jnp.int32)]
        for i in range(tc)
    ]
    given_embed = jnp.concatenate([given_num] + given_cat, axis=-1)

    mc = cfg["meta_cat"]
    meta_num = meta_x[:, : meta_x.shape[-1] - mc]
    meta_cat = [
        params["meta_embed"][i][meta_x[:, -mc + i].astype(jnp.int32)]
        for i in range(mc)
    ]
    meta_embed = jnp.concatenate([meta_num] + meta_cat, axis=-1)

    enc_in = jnp.concatenate(
        [
            given_embed.reshape(b, -1),
            x_n.reshape(b, -1),
            x_mark_enc.reshape(b, -1),
            meta_embed,
        ],
        axis=-1,
    )
    return enc_in, means, stdev


def forward(params, cfg, given_enc, x_enc, x_mark_enc, meta_x):
    b = given_enc.shape[0]
    P, T = cfg["pred_len"], cfg["tgt_num"]

    enc_in, means, stdev = build_enc_in(
        params, cfg, given_enc, x_enc, x_mark_enc, meta_x
    )

    # Fold the RevIN de-norm into the kernel epilogue.  Flattened output column
    # j corresponds to target feature j % T, so tiling stdev/means T-vectors
    # pred_len times along the last axis matches the reshape(b, P, T) layout.
    scale = jnp.tile(stdev.reshape(b, T), (1, P))
    shift = jnp.tile(means.reshape(b, T), (1, P))

    dec_flat = pallas_linear_fused(
        enc_in, params["W"], params["bias"], scale, shift
    )
    dec_out = dec_flat.reshape(b, P, T)
    # final slice [:, -pred_len:, :] is a no-op (already pred_len long)
    return dec_out


def forward_reference(params, cfg, given_enc, x_enc, x_mark_enc, meta_x):
    """Pure-JAX reference (same math, no Pallas) for a sanity check."""
    b = given_enc.shape[0]
    enc_in, means, stdev = build_enc_in(
        params, cfg, given_enc, x_enc, x_mark_enc, meta_x
    )
    dec_flat = enc_in @ params["W"] + params["bias"]
    dec_out = dec_flat.reshape(b, cfg["pred_len"], cfg["tgt_num"])
    if cfg["use_norm"]:
        dec_out = dec_out * stdev + means
    return dec_out


# ------------------------------------------------------------------ #
if __name__ == "__main__":
    cfg = make_config()
    B = 2

    key = jax.random.PRNGKey(0)
    k_in, k_param = jax.random.split(key)
    kg, kx, km, kmeta, kgc, kmc = jax.random.split(k_in, 6)

    W, S, P = cfg["window_size"], cfg["seq_len"], cfg["pred_len"]

    # continuous parts
    given_num = jax.random.normal(kg, (B, W, cfg["time_num"]), jnp.float32)
    given_cat_ids = jnp.stack(
        [
            jax.random.randint(
                jax.random.fold_in(kgc, i), (B, W), 0, cfg["time_num_class"][i]
            ).astype(jnp.float32)
            for i in range(cfg["time_cat"])
        ],
        axis=-1,
    )
    given_enc = jnp.concatenate([given_num, given_cat_ids], axis=-1)

    x_enc = jax.random.normal(kx, (B, S, cfg["tgt_num"]), jnp.float32)
    x_mark_enc = jax.random.normal(km, (B, W, cfg["time_cov_size"]), jnp.float32)

    meta_num_part = jax.random.normal(kmeta, (B, cfg["meta_num"]), jnp.float32)
    meta_cat_ids = jnp.stack(
        [
            jax.random.randint(
                jax.random.fold_in(kmc, i), (B,), 0, cfg["meta_num_class"][i]
            ).astype(jnp.float32)
            for i in range(cfg["meta_cat"])
        ],
        axis=-1,
    )
    meta_x = jnp.concatenate([meta_num_part, meta_cat_ids], axis=-1)

    params = init_params(cfg, k_param)

    out = forward(params, cfg, given_enc, x_enc, x_mark_enc, meta_x)
    out = jax.block_until_ready(out)

    ref = forward_reference(params, cfg, given_enc, x_enc, x_mark_enc, meta_x)
    assert out.shape == (B, P, cfg["tgt_num"]), out.shape
    assert jnp.allclose(out, ref, atol=1e-4, rtol=1e-4)

    print("KERNEL_OK")
</pallas_src>

<mosaic_0001>
module attributes {stable_mosaic.version = 11 : i64} {
  func.func @_linear_fused_kernel(%arg0: i32, %arg1: i32, %arg2: memref<2x168xf32, #tpu.memory_space<vmem>>, %arg3: memref<168x8xf32, #tpu.memory_space<vmem>>, %arg4: memref<1x8xf32, #tpu.memory_space<vmem>>, %arg5: memref<2x8xf32, #tpu.memory_space<vmem>>, %arg6: memref<2x8xf32, #tpu.memory_space<vmem>>, %arg7: memref<2x8xf32, #tpu.memory_space<vmem>>) attributes {dimension_semantics = [#tpu.dimension_semantics<parallel>, #tpu.dimension_semantics<parallel>], iteration_bounds = array<i64: 1, 1>, scalar_prefetch = 0 : i64, scratch_operands = 0 : i64, tpu.core_type = #tpu.core_type<tc>, window_params = [{transform_indices = @transform_0, window_bounds = array<i64: 2, 168>}, {transform_indices = @transform_1, window_bounds = array<i64: 168, 8>}, {transform_indices = @transform_2, window_bounds = array<i64: 1, 8>}, {transform_indices = @transform_3, window_bounds = array<i64: 2, 8>}, {transform_indices = @transform_4, window_bounds = array<i64: 2, 8>}, {transform_indices = @transform_5, window_bounds = array<i64: 2, 8>}]} {
    %c0 = arith.constant 0 : index
    %c0_0 = arith.constant 0 : index
    %0 = vector.load %arg2[%c0, %c0_0] : memref<2x168xf32, #tpu.memory_space<vmem>>, vector<2x168xf32>
    %c0_1 = arith.constant 0 : index
    %c0_2 = arith.constant 0 : index
    %1 = vector.load %arg3[%c0_1, %c0_2] : memref<168x8xf32, #tpu.memory_space<vmem>>, vector<168x8xf32>
    %cst = arith.constant dense<0.000000e+00> : vector<2x8xf32>
    %2 = tpu.matmul %0, %1, %cst {dimension_numbers = #tpu.dot_dimension_numbers<[1], [0], [0], [1], [0, 0, 1, 1], [], []>} : vector<2x168xf32>, vector<168x8xf32>, vector<2x8xf32> -> vector<2x8xf32>
    %c0_3 = arith.constant 0 : index
    %c0_4 = arith.constant 0 : index
    %3 = vector.load %arg4[%c0_3, %c0_4] : memref<1x8xf32, #tpu.memory_space<vmem>>, vector<1x8xf32>
    %4 = vector.broadcast %3 : vector<1x8xf32> to vector<2x8xf32>
    %5 = arith.addf %2, %4 : vector<2x8xf32>
    %c0_5 = arith.constant 0 : index
    %c0_6 = arith.constant 0 : index
    %6 = vector.load %arg5[%c0_5, %c0_6] : memref<2x8xf32, #tpu.memory_space<vmem>>, vector<2x8xf32>
    %7 = arith.mulf %5, %6 : vector<2x8xf32>
    %c0_7 = arith.constant 0 : index
    %c0_8 = arith.constant 0 : index
    %8 = vector.load %arg6[%c0_7, %c0_8] : memref<2x8xf32, #tpu.memory_space<vmem>>, vector<2x8xf32>
    %9 = arith.addf %7, %8 : vector<2x8xf32>
    %c0_9 = arith.constant 0 : index
    %c0_10 = arith.constant 0 : index
    %10 = vector.load %arg7[%c0_9, %c0_10] : memref<2x8xf32, #tpu.memory_space<vmem>>, vector<2x8xf32>
    tpu.vector_store %arg7[%c0_9, %c0_10], %9 {strides = array<i32>} : memref<2x8xf32, #tpu.memory_space<vmem>>, vector<2x8xf32>,
    return
  }
  func.func @transform_0(%arg0: i32, %arg1: i32) -> (i32, i32) {
    %c0_i32 = arith.constant 0 : i32
    %c0_i32_0 = arith.constant 0 : i32
    return %arg0, %c0_i32 : i32, i32
  }
  func.func @transform_1(%arg0: i32, %arg1: i32) -> (i32, i32) {
    %c0_i32 = arith.constant 0 : i32
    %c0_i32_0 = arith.constant 0 : i32
    return %c0_i32, %arg1 : i32, i32
  }
  func.func @transform_2(%arg0: i32, %arg1: i32) -> (i32, i32) {
    %c0_i32 = arith.constant 0 : i32
    %c0_i32_0 = arith.constant 0 : i32
    return %c0_i32, %arg1 : i32, i32
  }
  func.func @transform_3(%arg0: i32, %arg1: i32) -> (i32, i32) {
    %c0_i32 = arith.constant 0 : i32
    return %arg0, %arg1 : i32, i32
  }
  func.func @transform_4(%arg0: i32, %arg1: i32) -> (i32, i32) {
    %c0_i32 = arith.constant 0 : i32
    return %arg0, %arg1 : i32, i32
  }
  func.func @transform_5(%arg0: i32, %arg1: i32) -> (i32, i32) {
    %c0_i32 = arith.constant 0 : i32
    return %arg0, %arg1 : i32, i32
  }
}

</mosaic_0001>

<bundles_post_ra>
// kernel: _linear_fused_call.1
= control target key start
LH: loop header
LB: loop body
LE: loop exit
PB: predicated region body
PF: predicated region fallthrough
CT: control target
= control target key end

     0   :  { %v213_v3 = vmov 0.0|0.0   ;;  %vm60_vm0 = vcmask 326656   ;;  %s333_s0 = inlined_call_operand.vmem [shape: f32[2,168], index: 0, kind: input, shape index: {}]   ;;  %s334_s1 = inlined_call_operand.vmem [shape: f32[168,8], index: 1, kind: input, shape index: {}]   ;;  %s335_s2 = inlined_call_operand.vmem [shape: f32[1,8], index: 2, kind: input, shape index: {}]   ;;  %s336_s3 = inlined_call_operand.vmem [shape: f32[2,8], index: 3, kind: input, shape index: {}]   ;;  %s337_s4 = inlined_call_operand.vmem [shape: f32[2,8], index: 4, kind: input, shape index: {}]   ;;  %s338_s5 = inlined_call_operand.hbm [shape: f32[2,8], index: 5, kind: output, shape index: {}]  }
   0x1   :  { %v22_v0 = vld [vmem:[%s334_s1] sm:$0xff]  ;;  %v23_v1 = vld [vmem:[%s334_s1 + $0x8] sm:$0xff]  ;;  %v24_v2 = vld [vmem:[%s334_s1 + $0x10] sm:$0xff]  ;;  %156 = vmatprep.subr.bf16.mxu0 %v213_v3 }
   0x2   :  { %v157_v4 = vpack.c.bf16 %v23_v1, %v22_v0  ;;  %v25_v5 = vld [vmem:[%s334_s1 + $0x18] sm:$0xff]  ;;  %v26_v7 = vld [vmem:[%s334_s1 + $0x20] sm:$0xff]  ;;  %v27_v8 = vld [vmem:[%s334_s1 + $0x28] sm:$0xff] }
   0x3   :  { %v160_v6 = vpack.c.bf16 %v25_v5, %v24_v2  ;;  %v163_v9 = vpack.c.bf16 %v27_v8, %v26_v7  ;;  %v154_v10 = vld.sshfl [vmem:[%s333_s0] sm:$0x33 pattern:$0x76325410]  ;;  %v28_v11 = vld [vmem:[%s334_s1 + $0x30] sm:$0xff]  ;;  %v29_v12 = vld [vmem:[%s334_s1 + $0x38] sm:$0xff] }
   0x4   :  { %158 = vmatpush1.bf16.msra.mxu0 %v157_v4  ;;  %v58_v13 = vcombine.high %v154_v10, %v154_v10 }
   0x5   :  { %159 = vmatprep.subr.bf16.mxu0 %v213_v3 }
   0x8   :  { %161 = vmatpush1.bf16.msra.mxu0 %v160_v6 }
   0x9   :  { %162 = vmatprep.subr.bf16.mxu0 %v213_v3 }
   0xa   :  { %10 = vsyncpa [#allocation3], 0  ;;  %155 = vmatprep.mubr.msk.f32.mxu0 %vm60_vm0, %v58_v13  ;;  %v166_v14 = vpack.c.bf16 %v29_v12, %v28_v11  ;;  %v30_v15 = vld [vmem:[%s334_s1 + $0x40] sm:$0xff]  ;;  %v31_v16 = vld [vmem:[%s334_s1 + $0x48] sm:$0xff]  ;;  %v214_v33 = vmov 0.0   ;;  %s215_s16 = smov [#allocation2]  }
   0xb   :  { %v169_v17 = vpack.c.bf16 %v31_v16, %v30_v15  ;;  %v32_v18 = vld [vmem:[%s334_s1 + $0x50] sm:$0xff]  ;;  %v33_v19 = vld [vmem:[%s334_s1 + $0x58] sm:$0xff]  ;;  %v34_v21 = vld [vmem:[%s334_s1 + $0x60] sm:$0xff]  ;;  %s145_s17 = sshll.u32 %s215_s16, 4  ;;  %vm137_vm1 = vcmask 58368   ;;  %s146_s17 = int_to_ptr.vmem [resolvable:$true] %s145_s17 }
   0xc   :  { %164 = vmatpush1.bf16.msra.mxu0 %v163_v9  ;;  %v172_v20 = vpack.c.bf16 %v33_v19, %v32_v18  ;;  %v35_v22 = vld [vmem:[%s334_s1 + $0x68] sm:$0xff]  ;;  %v36_v24 = vld [vmem:[%s334_s1 + $0x70] sm:$0xff]  ;;  %v37_v25 = vld [vmem:[%s334_s1 + $0x78] sm:$0xff]  ;;  %p194_p1 = scmp.lt.s32.totalorder %s146_s17, %s146_s17 }
   0xd   :  { %165 = vmatprep.subr.bf16.mxu0 %v213_v3  ;;  %v175_v23 = vpack.c.bf16 %v35_v22, %v34_v21  ;;  %v178_v26 = vpack.c.bf16 %v37_v25, %v36_v24  ;;  %v38_v27 = vld [vmem:[%s334_s1 + $0x80] sm:$0xff]  ;;  %v39_v28 = vld [vmem:[%s334_s1 + $0x88] sm:$0xff]  ;;  %v40_v30 = vld [vmem:[%s334_s1 + $0x90] sm:$0xff] }
   0xe   :  { %v181_v29 = vpack.c.bf16 %v39_v28, %v38_v27  ;;  %v41_v31 = vld [vmem:[%s334_s1 + $0x98] sm:$0xff]  ;;  %v42_v34 = vld [vmem:[%s334_s1 + $0xa0] sm:$0xff]  ;;  %s189_s1 = scalar_lea.vmem %s146_s17, 32 }
   0xf   :  { %v184_v32 = vpack.c.bf16 %v41_v31, %v40_v30  ;;  %v153_v35 = vld [vmem:[%s335_s2] ss:$0 sm:$0xff]  ;;  %p190_p0 = scmp.ne.s32.totalorder %s146_s17, %s189_s1  ;;  %p195_p2 = scmp.lt.s32.totalorder %s189_s1, %s189_s1 }
  0x10   :  { %167 = vmatpush1.bf16.msra.mxu0 %v166_v14  ;;  %v133_v37 = vld [vmem:[%s336_s3] sm:$0x3] }
  0x11   :  { %168 = vmatprep.subr.bf16.mxu0 %v213_v3  ;;  %v135_v40 = vld [vmem:[%s337_s4] sm:$0x3]  ;;  %p196_p3 = por %p195_p2, %p194_p1 }
  0x13   :  { %p197_p4 = pnand %p196_p3, %p190_p0 }
  0x14   :  { %170 = vmatpush1.bf16.msra.mxu0 %v169_v17 }
  0x15   :  { %171 = vmatprep.subr.bf16.mxu0 %v213_v3 }
  0x18   :  { %173 = vmatpush1.bf16.msra.mxu0 %v172_v20 }
  0x19   :  { %174 = vmatprep.subr.bf16.mxu0 %v213_v3 }
  0x1c   :  { %176 = vmatpush1.bf16.msra.mxu0 %v175_v23 }
  0x1d   :  { %177 = vmatprep.subr.bf16.mxu0 %v213_v3 }
  0x20   :  { %179 = vmatpush1.bf16.msra.mxu0 %v178_v26 }
  0x21   :  { %180 = vmatprep.subr.bf16.mxu0 %v213_v3 }
  0x24   :  { %182 = vmatpush1.bf16.msra.mxu0 %v181_v29 }
  0x25   :  { %183 = vmatprep.subr.bf16.mxu0 %v213_v3 }
  0x28   :  { %185 = vmatpush1.bf16.msra.mxu0 %v184_v32 }
  0x29   :  { %103 = vmatprep.subr.mxu0 %v214_v33 }
  0x2c   :  { %104 = vmatpush1.msra.mxu0 %v42_v34 }
  0x2d   :  { %128 = vmatmul.mubr.f32.vlgmr.msra.gmra.mrb[0].mxu0 %v154_v10 }
 0x100   :  { %v129_v36 = vpop.f32.mrb[0].mxu0 }
 0x101   :  { %v130_v38 = vadd.f32 %v153_v35, %v129_v36  ;;  %v131_v39 = vpop.f32.mrb[1].mxu0 }
 0x103   :  { %v134_v41 = vmul.f32 %v133_v37, %v130_v38 }
 0x105   :  { %v136_v42 = vadd.f32 %v135_v40, %v134_v41 }
 0x107   :  { %138 = vst.msk [vmem:[#allocation2] sm:$0x3] %vm137_vm1, %v136_v42 }
 0x108   :  { %200 = shalt.err (!%p197_p4)
}
 0x109   :  { %s201_s18 = scalar_lea.hbm %s338_s5, 32 }
 0x10a   :  { %p202_p5 = scmp.ne.s32.totalorder %s338_s5, %s201_s18  ;;  %p205_p6 = scmp.lt.u32.totalorder %s201_s18, %s338_s5 }
 0x10c   :  { %p207_p7 = pnand %p205_p6, %p202_p5 }
 0x10e   :  { %210 = shalt.err (!%p207_p7)
}
 0x10f   :  { %148 = dma.vmem_to_hbm [thread:$0]  %s146_s17, 32, %s338_s5, [#allocation3]  }
 0x110   :  { %211 = dma.done.wait [#allocation3], 32  }
 0x111   :  { %212 = vsyncadd [#allocation3], 4294967264 }
 0x112   :  { %152 = vsyncpa [#allocation3], 1 }

</bundles_post_ra>
